<compile_context>
chip_gen: v7x
topology: tpu7x:2x2x1
jax: 0.10.0
libtpu: 0.0.40
codegen_flags: <defaults>
</compile_context>

<pallas_src>
import functools

import jax
import jax.numpy as jnp
from jax.experimental import pallas as pl
from jax.experimental.pallas import tpu as pltpu


def _node_embed_kernel(v_ref, w0_ref, wrest_ref, wfin_ref, bfin_ref, out_ref,
                       *, n_layers):
    # Layer 0 with the lifting layer folded in:
    #   relu((diag(v) @ W_lift)_flat @ W_layers[0]) == relu(v @ W0_folded).
    h = jnp.maximum(
        jnp.dot(v_ref[...], w0_ref[...], preferred_element_type=jnp.float32), 0.0)

    # Remaining fused GCN layers: one (D, D) matmul + relu each.
    for l in range(1, n_layers):
        h = jnp.maximum(
            jnp.dot(h, wrest_ref[l - 1], preferred_element_type=jnp.float32), 0.0)

    # Final projection (kron(I_N, W_final), zero-padded lanes) + tiled bias.
    out = jnp.dot(h, wfin_ref[...], preferred_element_type=jnp.float32) + bfin_ref[...]
    out_ref[...] = out.astype(out_ref.dtype)


def _choose_row_tile(m):
    """Pick the (b,t)-row tile: big enough to amortize per-grid-step overhead, small
    enough to keep tail padding low, and (when >=16 rows) keeping >=2 grid blocks so
    v7x's two TensorCores both get work. Has no effect on v5e/v6e correctness."""
    m8 = max(8, ((m + 7) // 8) * 8)
    best_tm, best_cost = 8, None
    for tm in (8, 16, 32, 64, 128, 256, 512, 1024, 2048):
        m_pad = ((m8 + tm - 1) // tm) * tm
        n_steps = m_pad // tm
        if m8 >= 16 and n_steps < 2:
            continue  # keep the 'parallel' axis shardable across 2 TensorCores
        cost = m_pad + 512 * n_steps  # padded rows + ~rows-equivalent step overhead
        if best_cost is None or cost < best_cost or (cost == best_cost and tm > best_tm):
            best_tm, best_cost = tm, cost
    return best_tm


def node_embed_forward(x, params, extract_latent=False):
    wlift = params["w_lift"].astype(jnp.float32)        # (N, emb)
    adj = params["adjacency"].astype(jnp.float32)       # (E, N, N)
    wgcn = params["w_gcn"].astype(jnp.float32)          # (E, n_layers, emb, emb // E)
    wfin = params["w_final"].astype(jnp.float32)        # (emb, out_emb)
    bfin = params["b_final"].astype(jnp.float32)        # (1, out_emb)
    state_indices = jnp.asarray(params["state_indices"])

    B, T, _ = x.shape
    N, emb = wlift.shape
    n_layers = int(wgcn.shape[1])
    S = int(state_indices.shape[0])
    out_emb = wfin.shape[1]
    M = B * T
    D = N * emb                          # flattened (node, feature) width (lane dim)
    DO = N * out_emb                     # flattened output width
    DO_pad = ((DO + 127) // 128) * 128   # lane-dense (unmasked) output stores

    # ---- constant weight precompute (tiny, once per call) -------------------
    # F.normalize(A, dim=0): each column n divided by max(||A[:, n]||_2, 1e-12).
    col_norm = jnp.sqrt(jnp.sum(adj * adj, axis=1, keepdims=True))       # (E, 1, N)
    weighting = adj / jnp.maximum(col_norm, 1e-12)                        # (E, N, N)

    # Fused per-layer GCN operator on the flattened (node, feature) axis.
    big = jnp.einsum("ekn,eldo->lkdneo", weighting, wgcn)  # (L, N, emb, N, E, emb//E)
    w_layers = big.reshape(n_layers, D, D)

    # Fold the lifting scaling into layer 0 (see header comment).
    w0_folded = jnp.einsum("nd,ndc->nc", wlift,
                           w_layers[0].reshape(N, emb, D))                # (N, D)
    if n_layers > 1:
        w_layers_rest = w_layers[1:]
    else:
        w_layers_rest = jnp.zeros((1, D, D), jnp.float32)  # dummy, never read
    n_rest = w_layers_rest.shape[0]

    # Final projection kron(I_N, W_final) + tiled bias, zero-padded to DO_pad lanes.
    # TODO(synk): kron(I_N, W_final) feeds (N-1)/N zero blocks to the MXU; fine at
    # small N, restructure the final projection if N grows large.
    w_fin_big = jnp.einsum("kn,do->kdno", jnp.eye(N, dtype=jnp.float32),
                           wfin).reshape(D, DO)
    w_fin_big = jnp.pad(w_fin_big, ((0, 0), (0, DO_pad - DO)))            # (D, DO_pad)
    b_fin_big = jnp.pad(jnp.tile(bfin.reshape(1, out_emb), (1, N)),
                        ((0, 0), (0, DO_pad - DO)))                       # (1, DO_pad)

    # ---- dynamic input: per-(b, t) diagonal scaling vector ------------------
    vals = x.reshape(M, -1)[:, state_indices].astype(jnp.float32)         # (M, S)
    v = jnp.concatenate([vals, jnp.ones((M, N - S), jnp.float32)], axis=1)  # (M, N)

    TM = _choose_row_tile(M)
    M_pad = ((M + TM - 1) // TM) * TM
    v = jnp.pad(v, ((0, M_pad - M), (0, 0)))

    kernel = functools.partial(_node_embed_kernel, n_layers=n_layers)
    grid = (M_pad // TM,)

    flops = 2 * M_pad * (N * D + (n_layers - 1) * D * D + D * DO_pad) + M_pad * DO_pad
    bytes_accessed = 4 * (M_pad * (N + DO_pad) + N * D + n_rest * D * D
                          + D * DO_pad + DO_pad)

    # VMEM budget: double-buffered streaming tiles + resident weights, 2x headroom.
    # TODO(synk): if N*emb grows so resident weights (~4*L*D^2 B) approach half the
    # scoped limit (esp. v7x's 64 MiB VMEM), tile the contraction dim with an extra
    # 'arbitrary' grid axis and an f32 VMEM accumulator instead of keeping residency.
    stream_bytes = 4 * TM * (N + DO_pad)
    resident_bytes = 4 * (N * D + n_rest * D * D + D * DO_pad + DO_pad)
    vmem_limit = int(min(48 * 2**20,
                         max(8 * 2**20, 4 * (stream_bytes + resident_bytes))))

    out = pl.pallas_call(
        kernel,
        out_shape=jax.ShapeDtypeStruct((M_pad, DO_pad), jnp.float32),
        grid=grid,
        in_specs=[
            pl.BlockSpec((TM, N), lambda m: (m, 0)),              # v (only streamed input)
            pl.BlockSpec((N, D), lambda m: (0, 0)),               # lift folded into layer 0
            pl.BlockSpec((n_rest, D, D), lambda m: (0, 0, 0)),    # layers 1..L-1 (resident)
            pl.BlockSpec((D, DO_pad), lambda m: (0, 0)),          # kron(I, W_final), padded
            pl.BlockSpec((1, DO_pad), lambda m: (0, 0)),          # tiled bias, padded
        ],
        out_specs=pl.BlockSpec((TM, DO_pad), lambda m: (m, 0)),   # lane-dense slab
        compiler_params=pltpu.CompilerParams(
            dimension_semantics=("parallel",),
            vmem_limit_bytes=vmem_limit),
        cost_estimate=pl.CostEstimate(flops=flops, transcendentals=0,
                                      bytes_accessed=bytes_accessed),
    )(v, w0_folded, w_layers_rest, w_fin_big, b_fin_big)

    out = out[:M, :DO].reshape(B, T, N, out_emb)
    if extract_latent:
        # Final projection acts per node, so selecting latent nodes after projection
        # equals selecting them before (matches the torch semantics).
        out = out[:, :, jnp.asarray(params["latent_indices"])]
    return out


def node_embed_reference(x, params):
    """Pure-JAX reference mirroring the PyTorch forward, for verification."""
    wlift, adj = params["w_lift"], params["adjacency"].astype(jnp.float32)
    wgcn, wfin, bfin = params["w_gcn"], params["w_final"], params["b_final"]
    state_indices = jnp.asarray(params["state_indices"])
    N, emb = wlift.shape
    E, n_layers = wgcn.shape[0], wgcn.shape[1]

    vals = x[:, :, state_indices]                                    # (B, T, S)
    B, T, S = vals.shape
    v = jnp.concatenate([vals, jnp.ones((B, T, N - S), vals.dtype)], axis=-1)
    one_hot = jnp.eye(N, dtype=jnp.float32)[None, None] * v[..., None]
    h = jnp.einsum("btij,jk->btik", one_hot, wlift)
    for l in range(n_layers):
        outs = []
        for e in range(E):
            a = adj[e]
            norm = jnp.sqrt(jnp.sum(a * a, axis=0, keepdims=True))
            w = a / jnp.maximum(norm, 1e-12)
            y = jnp.einsum("kn,btkd->btnd", w, h)
            z = jax.nn.relu(jnp.einsum("btnd,do->btno", y, wgcn[e, l]))
            outs.append(z)
        h = jnp.concatenate(outs, axis=-1)
    return jnp.einsum("btnd,do->btno", h, wfin) + bfin[0]


if __name__ == "__main__":
    B, T = 2, 4          # batch, sequence
    S = 6                # number of state entities (sorted keys of entities_to_index)
    L = 2                # latent entities
    N = S + L            # all nodes
    E = 2                # edge types
    EMB = 16             # embed_size (divisible by E, as GCN assumes)
    OUT_EMB = 8          # out_embed_size
    N_LAYERS = 3

    key = jax.random.PRNGKey(0)
    k_x, k_lift, k_gcn, k_fin, k_bias = jax.random.split(key, 5)

    x = jax.random.normal(k_x, (B, T, S), dtype=jnp.float32)

    # adjacency: identity per edge type plus deterministic directed edges (uint8 -> float)
    adj = jnp.broadcast_to(jnp.eye(N, dtype=jnp.float32), (E, N, N))
    edge_list = [[(0, 6), (1, 6), (2, 7)], [(3, 7), (4, 6), (5, 7), (6, 7)]]
    for et, edges in enumerate(edge_list):
        for s, d in edges:
            adj = adj.at[et, s, d].set(1.0)

    params = dict(
        w_lift=jax.random.normal(k_lift, (N, EMB), dtype=jnp.float32) * 0.1,
        adjacency=adj,
        w_gcn=jax.random.normal(k_gcn, (E, N_LAYERS, EMB, EMB // E), dtype=jnp.float32) * 0.1,
        w_final=jax.random.normal(k_fin, (EMB, OUT_EMB), dtype=jnp.float32) * 0.1,
        b_final=jax.random.normal(k_bias, (1, OUT_EMB), dtype=jnp.float32) * 0.1,
        state_indices=list(range(S)),        # entities_to_index = {entity_i: i}
        latent_indices=list(range(S, N)),    # latent entities appended after state keys
    )

    out = node_embed_forward(x, params, extract_latent=False)
    out = jax.block_until_ready(out)

    ref = node_embed_reference(x, params)
    assert out.shape == (B, T, N, OUT_EMB), out.shape
    max_err = float(jnp.max(jnp.abs(out - ref)))
    assert jnp.allclose(out, ref, atol=1e-4, rtol=1e-4), max_err
    print("KERNEL_OK")
</pallas_src>

<mosaic_0001>
module attributes {stable_mosaic.version = 11 : i64} {
  func.func @_node_embed_kernel(%arg0: i32, %arg1: memref<8x8xf32, #tpu.memory_space<vmem>>, %arg2: memref<8x128xf32, #tpu.memory_space<vmem>>, %arg3: memref<2x128x128xf32, #tpu.memory_space<vmem>>, %arg4: memref<128x128xf32, #tpu.memory_space<vmem>>, %arg5: memref<1x128xf32, #tpu.memory_space<vmem>>, %arg6: memref<8x128xf32, #tpu.memory_space<vmem>>) attributes {dimension_semantics = [#tpu.dimension_semantics<parallel>], iteration_bounds = array<i64: 1>, scalar_prefetch = 0 : i64, scratch_operands = 0 : i64, tpu.core_type = #tpu.core_type<tc>, window_params = [{transform_indices = @transform_0, window_bounds = array<i64: 8, 8>}, {pipeline_mode = #tpu.pipeline_mode<synchronous>, transform_indices = @transform_1, window_bounds = array<i64: 8, 128>}, {pipeline_mode = #tpu.pipeline_mode<synchronous>, transform_indices = @transform_2, window_bounds = array<i64: 2, 128, 128>}, {pipeline_mode = #tpu.pipeline_mode<synchronous>, transform_indices = @transform_3, window_bounds = array<i64: 128, 128>}, {pipeline_mode = #tpu.pipeline_mode<synchronous>, transform_indices = @transform_4, window_bounds = array<i64: 1, 128>}, {transform_indices = @transform_5, window_bounds = array<i64: 8, 128>}]} {
    %c0 = arith.constant 0 : index
    %c0_0 = arith.constant 0 : index
    %0 = vector.load %arg1[%c0, %c0_0] : memref<8x8xf32, #tpu.memory_space<vmem>>, vector<8x8xf32>
    %c0_1 = arith.constant 0 : index
    %c0_2 = arith.constant 0 : index
    %1 = vector.load %arg2[%c0_1, %c0_2] : memref<8x128xf32, #tpu.memory_space<vmem>>, vector<8x128xf32>
    %cst = arith.constant dense<0.000000e+00> : vector<8x128xf32>
    %2 = tpu.matmul %0, %1, %cst {dimension_numbers = #tpu.dot_dimension_numbers<[1], [0], [0], [1], [0, 0, 1, 1], [], []>} : vector<8x8xf32>, vector<8x128xf32>, vector<8x128xf32> -> vector<8x128xf32>
    %cst_3 = arith.constant 0.000000e+00 : f32
    %3 = vector.broadcast %cst_3 : f32 to vector<8x128xf32>
    %4 = arith.maximumf %2, %3 : vector<8x128xf32>
    %c0_4 = arith.constant 0 : index
    %c0_5 = arith.constant 0 : index
    %c0_6 = arith.constant 0 : index
    %5 = vector.load %arg3[%c0_4, %c0_5, %c0_6] : memref<2x128x128xf32, #tpu.memory_space<vmem>>, vector<1x128x128xf32>
    %6 = vector.shape_cast %5 : vector<1x128x128xf32> to vector<128x128xf32>
    %cst_7 = arith.constant dense<0.000000e+00> : vector<8x128xf32>
    %7 = tpu.matmul %4, %6, %cst_7 {dimension_numbers = #tpu.dot_dimension_numbers<[1], [0], [0], [1], [0, 0, 1, 1], [], []>} : vector<8x128xf32>, vector<128x128xf32>, vector<8x128xf32> -> vector<8x128xf32>
    %cst_8 = arith.constant 0.000000e+00 : f32
    %8 = vector.broadcast %cst_8 : f32 to vector<8x128xf32>
    %9 = arith.maximumf %7, %8 : vector<8x128xf32>
    %c1 = arith.constant 1 : index
    %c0_9 = arith.constant 0 : index
    %c0_10 = arith.constant 0 : index
    %10 = vector.load %arg3[%c1, %c0_9, %c0_10] : memref<2x128x128xf32, #tpu.memory_space<vmem>>, vector<1x128x128xf32>
    %11 = vector.shape_cast %10 : vector<1x128x128xf32> to vector<128x128xf32>
    %cst_11 = arith.constant dense<0.000000e+00> : vector<8x128xf32>
    %12 = tpu.matmul %9, %11, %cst_11 {dimension_numbers = #tpu.dot_dimension_numbers<[1], [0], [0], [1], [0, 0, 1, 1], [], []>} : vector<8x128xf32>, vector<128x128xf32>, vector<8x128xf32> -> vector<8x128xf32>
    %cst_12 = arith.constant 0.000000e+00 : f32
    %13 = vector.broadcast %cst_12 : f32 to vector<8x128xf32>
    %14 = arith.maximumf %12, %13 : vector<8x128xf32>
    %c0_13 = arith.constant 0 : index
    %c0_14 = arith.constant 0 : index
    %15 = vector.load %arg4[%c0_13, %c0_14] : memref<128x128xf32, #tpu.memory_space<vmem>>, vector<128x128xf32>
    %cst_15 = arith.constant dense<0.000000e+00> : vector<8x128xf32>
    %16 = tpu.matmul %14, %15, %cst_15 {dimension_numbers = #tpu.dot_dimension_numbers<[1], [0], [0], [1], [0, 0, 1, 1], [], []>} : vector<8x128xf32>, vector<128x128xf32>, vector<8x128xf32> -> vector<8x128xf32>
    %c0_16 = arith.constant 0 : index
    %c0_17 = arith.constant 0 : index
    %17 = vector.load %arg5[%c0_16, %c0_17] : memref<1x128xf32, #tpu.memory_space<vmem>>, vector<1x128xf32>
    %18 = vector.broadcast %17 : vector<1x128xf32> to vector<8x128xf32>
    %19 = arith.addf %16, %18 : vector<8x128xf32>
    %c0_18 = arith.constant 0 : index
    %c0_19 = arith.constant 0 : index
    %20 = vector.load %arg6[%c0_18, %c0_19] : memref<8x128xf32, #tpu.memory_space<vmem>>, vector<8x128xf32>
    tpu.vector_store %arg6[%c0_18, %c0_19], %19 {strides = array<i32>} : memref<8x128xf32, #tpu.memory_space<vmem>>, vector<8x128xf32>,
    return
  }
  func.func @transform_0(%arg0: i32) -> (i32, i32) {
    %c0_i32 = arith.constant 0 : i32
    %c0_i32_0 = arith.constant 0 : i32
    return %arg0, %c0_i32 : i32, i32
  }
  func.func @transform_1(%arg0: i32) -> (i32, i32) {
    %c0_i32 = arith.constant 0 : i32
    %c0_i32_0 = arith.constant 0 : i32
    %c0_i32_1 = arith.constant 0 : i32
    return %c0_i32, %c0_i32_0 : i32, i32
  }
  func.func @transform_2(%arg0: i32) -> (i32, i32, i32) {
    %c0_i32 = arith.constant 0 : i32
    %c0_i32_0 = arith.constant 0 : i32
    %c0_i32_1 = arith.constant 0 : i32
    %c0_i32_2 = arith.constant 0 : i32
    return %c0_i32, %c0_i32_0, %c0_i32_1 : i32, i32, i32
  }
  func.func @transform_3(%arg0: i32) -> (i32, i32) {
    %c0_i32 = arith.constant 0 : i32
    %c0_i32_0 = arith.constant 0 : i32
    %c0_i32_1 = arith.constant 0 : i32
    return %c0_i32, %c0_i32_0 : i32, i32
  }
  func.func @transform_4(%arg0: i32) -> (i32, i32) {
    %c0_i32 = arith.constant 0 : i32
    %c0_i32_0 = arith.constant 0 : i32
    %c0_i32_1 = arith.constant 0 : i32
    return %c0_i32, %c0_i32_0 : i32, i32
  }
  func.func @transform_5(%arg0: i32) -> (i32, i32) {
    %c0_i32 = arith.constant 0 : i32
    %c0_i32_0 = arith.constant 0 : i32
    return %arg0, %c0_i32 : i32, i32
  }
}

</mosaic_0001>

<bundles_post_ra>
// kernel: tpu_custom_call.1
= control target key start
LH: loop header
LB: loop body
LE: loop exit
PB: predicated region body
PF: predicated region fallthrough
CT: control target
= control target key end

     0   :  { %10 = vsyncpa [#allocation3], 0  ;;  %s936_s0 = inlined_call_operand.hbm [shape: f32[8,8], index: 0, kind: input, shape index: {}]   ;;  %s937_s1 = inlined_call_operand.hbm [shape: f32[8,128], index: 1, kind: input, shape index: {}]   ;;  %s938_s2 = inlined_call_operand.hbm [shape: f32[2,128,128], index: 2, kind: input, shape index: {}]   ;;  %s939_s3 = inlined_call_operand.hbm [shape: f32[128,128], index: 3, kind: input, shape index: {}]   ;;  %s940_s4 = inlined_call_operand.vmem [shape: f32[1,128], index: 4, kind: input, shape index: {}]   ;;  %s941_s5 = inlined_call_operand.hbm [shape: f32[8,128], index: 5, kind: output, shape index: {}]  }
   0x1   :  { %11 = vsyncpa [#allocation6], 0 }
   0x2   :  { %12 = vsyncpa [#allocation9], 0 }
   0x3   :  { %13 = vsyncpa [#allocation4], 0  ;;  %s800_s18 = smov [#allocation5]   ;;  %s801_s20 = smov [#allocation2]  }
   0x4   :  { %s30_s19 = sshll.u32 %s800_s18, 4  ;;  %s20_s21 = sshll.u32 %s801_s20, 4  ;;  %s31_s19 = int_to_ptr.vmem [resolvable:$true] %s30_s19  ;;  %s21_s21 = int_to_ptr.vmem [resolvable:$true] %s20_s21 }
   0x5   :  { %s682_s24 = scalar_lea.hbm %s937_s1, 128 }
   0x6   :  { %p683_p0 = scmp.ne.s32.totalorder %s937_s1, %s682_s24  ;;  %p686_p1 = scmp.lt.u32.totalorder %s682_s24, %s937_s1 }
   0x8   :  { %p688_p2 = pnand %p686_p1, %p683_p0 }
   0xa   :  { %691 = shalt.err (!%p688_p2)
}
   0xb   :  { %s692_s29 = scalar_lea.vmem %s31_s19, 128  ;;  %p697_p4 = scmp.lt.s32.totalorder %s31_s19, %s31_s19 }
   0xc   :  { %p693_p3 = scmp.ne.s32.totalorder %s31_s19, %s692_s29  ;;  %p698_p5 = scmp.lt.s32.totalorder %s692_s29, %s692_s29 }
   0xe   :  { %p699_p6 = por %p698_p5, %p697_p4 }
  0x10   :  { %p700_p7 = pnand %p699_p6, %p693_p3 }
  0x12   :  { %703 = shalt.err (!%p700_p7)
}
  0x13   :  { %33 = dma.hbm_to_vmem [thread:$0]  %s937_s1, 128, %s31_s19, [#allocation6]  }
  0x14   :  { %s704_s9 = scalar_lea.hbm %s936_s0, 128 }
  0x15   :  { %p705_p8 = scmp.ne.s32.totalorder %s936_s0, %s704_s9  ;;  %p708_p9 = scmp.lt.u32.totalorder %s704_s9, %s936_s0 }
  0x17   :  { %p710_p10 = pnand %p708_p9, %p705_p8 }
  0x19   :  { %713 = shalt.err (!%p710_p10)
}
  0x1a   :  { %s714_s14 = scalar_lea.vmem %s21_s21, 128  ;;  %p719_p12 = scmp.lt.s32.totalorder %s21_s21, %s21_s21 }
  0x1b   :  { %p715_p11 = scmp.ne.s32.totalorder %s21_s21, %s714_s14  ;;  %p720_p13 = scmp.lt.s32.totalorder %s714_s14, %s714_s14 }
  0x1d   :  { %p721_p0 = por %p720_p13, %p719_p12 }
  0x1f   :  { %p722_p1 = pnand %p721_p0, %p715_p11 }
  0x21   :  { %725 = shalt.err (!%p722_p1)
}
  0x22   :  { %23 = dma.hbm_to_vmem [thread:$0]  %s936_s0, 128, %s21_s21, [#allocation3]  }
  0x23   :  { %s802_s16 = smov [#allocation7]   ;;  %s726_s20 = scalar_lea.hbm %s938_s2, 4096 }
  0x24   :  { %s39_s17 = sshll.u32 %s802_s16, 4  ;;  %p727_p2 = scmp.ne.s32.totalorder %s938_s2, %s726_s20  ;;  %s40_s17 = int_to_ptr.vmem [resolvable:$true] %s39_s17 }
  0x25   :  { %p730_p3 = scmp.lt.u32.totalorder %s726_s20, %s938_s2 }
  0x27   :  { %p732_p4 = pnand %p730_p3, %p727_p2 }
  0x29   :  { %735 = shalt.err (!%p732_p4)
}
  0x2a   :  { %s736_s26 = scalar_lea.vmem %s40_s17, 4096  ;;  %p741_p6 = scmp.lt.s32.totalorder %s40_s17, %s40_s17 }
  0x2b   :  { %p737_p5 = scmp.ne.s32.totalorder %s40_s17, %s736_s26  ;;  %p742_p7 = scmp.lt.s32.totalorder %s736_s26, %s736_s26 }
  0x2d   :  { %p743_p8 = por %p742_p7, %p741_p6 }
  0x2f   :  { %p744_p9 = pnand %p743_p8, %p737_p5 }
  0x31   :  { %747 = shalt.err (!%p744_p9)
}
  0x32   :  { %s803_s0 = smov 128   ;;  %s804_s21 = smov 8  }
  0x33   :  { %45 = dma.hbm_to_vmem [thread:$0]  %s938_s2, 4096, %s40_s17, [#allocation6], %s803_s0, %s803_s0, %s804_s21  }
  0x34   :  { %s805_s29 = smov [#allocation8]   ;;  %s748_s8 = scalar_lea.hbm %s939_s3, 2048 }
  0x35   :  { %s51_s30 = sshll.u32 %s805_s29, 4  ;;  %p749_p10 = scmp.ne.s32.totalorder %s939_s3, %s748_s8  ;;  %s52_s30 = int_to_ptr.vmem [resolvable:$true] %s51_s30 }
  0x36   :  { %p752_p11 = scmp.lt.u32.totalorder %s748_s8, %s939_s3 }
  0x38   :  { %p754_p12 = pnand %p752_p11, %p749_p10 }
  0x3a   :  { %757 = shalt.err (!%p754_p12)
}
  0x3b   :  { %s758_s13 = scalar_lea.vmem %s52_s30, 2048  ;;  %p763_p0 = scmp.lt.s32.totalorder %s52_s30, %s52_s30 }
  0x3c   :  { %p759_p13 = scmp.ne.s32.totalorder %s52_s30, %s758_s13  ;;  %p764_p1 = scmp.lt.s32.totalorder %s758_s13, %s758_s13 }
  0x3e   :  { %p765_p2 = por %p764_p1, %p763_p0 }
  0x40   :  { %p766_p3 = pnand %p765_p2, %p759_p13 }
  0x42   :  { %769 = shalt.err (!%p766_p3)
}
  0x43   :  { %57 = dma.hbm_to_vmem [thread:$0]  %s939_s3, 2048, %s52_s30, [#allocation9], %s803_s0, %s803_s0, %s804_s21  }
  0x44   :  { %792 = dma.done.wait [#allocation3], 128  }
  0x45   :  { %793 = vsyncadd [#allocation3], 4294967168 }
  0x46   :  { %794 = dma.done.wait [#allocation6], 4224  }
  0x47   :  { %795 = vsyncadd [#allocation6], 4294963072 }
  0x48   :  { %796 = dma.done.wait [#allocation9], 2048  }
  0x49   :  { %797 = vsyncadd [#allocation9], 4294965248  ;;  %v806_v0 = vmov 0.0   ;;  %vm807_vm0 = vmmov 0   ;;  %v808_v1 = vmov 0.0|0.0   ;;  %vm74_vm1 = vcmask 64512  }
  0x4a   :  { %490 = vmatprep.subr.mxu0 %v806_v0  ;;  %492 = vmatprep.mubr.msk.f32.mxu0 %vm807_vm0, %v806_v0  ;;  %v73_v2 = vld [vmem:[#allocation5] sm:$0xff]  ;;  %v72_v3 = vld [vmem:[#allocation2] sm:$0xff]  ;;  %v149_v4 = vld [vmem:[#allocation7] sm:$0xff]  ;;  %s809_s15 = smov [#allocation10]  }
  0x4b   :  { %600 = vmatprep.subr.bf16.mxu1 %v808_v1  ;;  %527 = vmatprep.mubr.msk.f32.mxu1 %vm807_vm0, %v806_v0  ;;  %v150_v5 = vld [vmem:[#allocation7 + $0x8] sm:$0xff]  ;;  %v151_v6 = vld [vmem:[#allocation7 + $0x10] sm:$0xff]  ;;  %v152_v7 = vld [vmem:[#allocation7 + $0x18] sm:$0xff]  ;;  %s424_s16 = sshll.u32 %s809_s15, 4  ;;  %s425_s16 = int_to_ptr.vmem [resolvable:$true] %s424_s16 }
  0x4c   :  { %491 = vmatpush3.msra.mxu0 %v73_v2  ;;  %v601_v8 = vpack.c.bf16 %v150_v5, %v149_v4  ;;  %v604_v9 = vpack.c.bf16 %v152_v7, %v151_v6  ;;  %v153_v10 = vld [vmem:[#allocation7 + $0x20] sm:$0xff]  ;;  %v154_v11 = vld [vmem:[#allocation7 + $0x28] sm:$0xff]  ;;  %v155_v13 = vld [vmem:[#allocation7 + $0x30] sm:$0xff]  ;;  %s770_s17 = scalar_lea.vmem %s425_s16, 128  ;;  %p775_p5 = scmp.lt.s32.totalorder %s425_s16, %s425_s16 }
  0x4d   :  { %493 = vmatmul.mubr.msk.f32.vlgmr.msra.gmra.mrb[0].mxu0 %vm74_vm1, %v72_v3  ;;  %624 = vmatprep.subr.bf16.mxu0 %v808_v1  ;;  %v607_v12 = vpack.c.bf16 %v154_v11, %v153_v10  ;;  %v156_v14 = vld [vmem:[#allocation7 + $0x38] sm:$0xff]  ;;  %v157_v16 = vld [vmem:[#allocation7 + $0x40] sm:$0xff]  ;;  %v158_v17 = vld [vmem:[#allocation7 + $0x48] sm:$0xff]  ;;  %p771_p4 = scmp.ne.s32.totalorder %s425_s16, %s770_s17  ;;  %p776_p6 = scmp.lt.s32.totalorder %s770_s17, %s770_s17 }
  0x4e   :  { %562 = vmatprep.mubr.msk.f32.mxu0 %vm807_vm0, %v806_v0  ;;  %602 = vmatpush3.bf16.msra.mxu1 %v601_v8  ;;  %v610_v15 = vpack.c.bf16 %v156_v14, %v155_v13  ;;  %v613_v18 = vpack.c.bf16 %v158_v17, %v157_v16  ;;  %v159_v19 = vld [vmem:[#allocation7 + $0x50] sm:$0xff]  ;;  %v160_v20 = vld [vmem:[#allocation7 + $0x58] sm:$0xff]  ;;  %v161_v22 = vld [vmem:[#allocation7 + $0x60] sm:$0xff] }
  0x4f   :  { %603 = vmatprep.subr.bf16.mxu1 %v808_v1  ;;  %v616_v21 = vpack.c.bf16 %v160_v20, %v159_v19  ;;  %v162_v23 = vld [vmem:[#allocation7 + $0x68] sm:$0xff]  ;;  %v163_v25 = vld [vmem:[#allocation7 + $0x70] sm:$0xff]  ;;  %v164_v26 = vld [vmem:[#allocation7 + $0x78] sm:$0xff]  ;;  %p777_p7 = por %p776_p6, %p775_p5 }
  0x50   :  { %v619_v24 = vpack.c.bf16 %v162_v23, %v161_v22  ;;  %v622_v27 = vpack.c.bf16 %v164_v26, %v163_v25  ;;  %v237_v28 = vld [vmem:[#allocation7 + $0x80] sm:$0xff]  ;;  %v238_v29 = vld [vmem:[#allocation7 + $0x88] sm:$0xff]  ;;  %v239_v30 = vld [vmem:[#allocation7 + $0x90] sm:$0xff] }
  0x51   :  { %v625_v31 = vpack.c.bf16 %v238_v29, %v237_v28  ;;  %v240_v32 = vld [vmem:[#allocation7 + $0x98] sm:$0xff]  ;;  %v241_v34 = vld [vmem:[#allocation7 + $0xa0] sm:$0xff]  ;;  %v242_v35 = vld [vmem:[#allocation7 + $0xa8] sm:$0xff]  ;;  %p778_p8 = pnand %p777_p7, %p771_p4 }
  0x52   :  { %605 = vmatpush3.bf16.msra.mxu1 %v604_v9  ;;  %v628_v33 = vpack.c.bf16 %v240_v32, %v239_v30  ;;  %v631_v36 = vpack.c.bf16 %v242_v35, %v241_v34  ;;  %v243_v37 = vld [vmem:[#allocation7 + $0xb0] sm:$0xff]  ;;  %v244_v38 = vld [vmem:[#allocation7 + $0xb8] sm:$0xff]  ;;  %v245_v40 = vld [vmem:[#allocation7 + $0xc0] sm:$0xff] }
  0x53   :  { %606 = vmatprep.subr.bf16.mxu1 %v808_v1  ;;  %626 = vmatpush3.bf16.msra.mxu0 %v625_v31  ;;  %v634_v39 = vpack.c.bf16 %v244_v38, %v243_v37  ;;  %v246_v41 = vld [vmem:[#allocation7 + $0xc8] sm:$0xff]  ;;  %v247_v43 = vld [vmem:[#allocation7 + $0xd0] sm:$0xff]  ;;  %v248_v44 = vld [vmem:[#allocation7 + $0xd8] sm:$0xff] }
  0x54   :  { %627 = vmatprep.subr.bf16.mxu0 %v808_v1  ;;  %v637_v42 = vpack.c.bf16 %v246_v41, %v245_v40  ;;  %v640_v45 = vpack.c.bf16 %v248_v44, %v247_v43  ;;  %v249_v46 = vld [vmem:[#allocation7 + $0xe0] sm:$0xff]  ;;  %v250_v47 = vld [vmem:[#allocation7 + $0xe8] sm:$0xff]  ;;  %v251_v52 = vld [vmem:[#allocation7 + $0xf0] sm:$0xff] }
  0x55   :  { %v643_v48 = vpack.c.bf16 %v250_v47, %v249_v46  ;;  %v252_v53 = vld [vmem:[#allocation7 + $0xf8] sm:$0xff]  ;;  %v324_v55 = vld [vmem:[#allocation8] sm:$0xff]  ;;  %v325_v56 = vld [vmem:[#allocation8 + $0x8] sm:$0xff] }
  0x56   :  { %608 = vmatpush3.bf16.msra.mxu1 %v607_v12  ;;  %v646_v54 = vpack.c.bf16 %v252_v53, %v251_v52  ;;  %v326_v57 = vld [vmem:[#allocation8 + $0x10] sm:$0xff]  ;;  %v649_v58 = vpack.c.bf16 %v325_v56, %v324_v55  ;;  %v327_v59 = vld [vmem:[#allocation8 + $0x18] sm:$0xff]  ;;  %v328_v61 = vld [vmem:[#allocation8 + $0x20] sm:$0xff] }
  0x57   :  { %609 = vmatprep.subr.bf16.mxu1 %v808_v1  ;;  %629 = vmatpush3.bf16.msra.mxu0 %v628_v33  ;;  %v652_v60 = vpack.c.bf16 %v327_v59, %v326_v57  ;;  %v329_v62 = vld [vmem:[#allocation8 + $0x28] sm:$0xff]  ;;  %v331_v2 = vld [vmem:[#allocation8 + $0x38] sm:$0xff]  ;;  %v332_v4 = vld [vmem:[#allocation8 + $0x40] sm:$0xff] }
  0x58   :  { %630 = vmatprep.subr.bf16.mxu0 %v808_v1  ;;  %v655_v63 = vpack.c.bf16 %v329_v62, %v328_v61  ;;  %v333_v5 = vld [vmem:[#allocation8 + $0x48] sm:$0xff]  ;;  %v334_v7 = vld [vmem:[#allocation8 + $0x50] sm:$0xff]  ;;  %v335_v8 = vld [vmem:[#allocation8 + $0x58] sm:$0xff] }
  0x59   :  { %v661_v6 = vpack.c.bf16 %v333_v5, %v332_v4  ;;  %v664_v9 = vpack.c.bf16 %v335_v8, %v334_v7  ;;  %v336_v10 = vld [vmem:[#allocation8 + $0x60] sm:$0xff]  ;;  %v337_v11 = vld [vmem:[#allocation8 + $0x68] sm:$0xff]  ;;  %v338_v16 = vld [vmem:[#allocation8 + $0x70] sm:$0xff] }
  0x5a   :  { %611 = vmatpush3.bf16.msra.mxu1 %v610_v15  ;;  %v667_v12 = vpack.c.bf16 %v337_v11, %v336_v10  ;;  %v339_v17 = vld [vmem:[#allocation8 + $0x78] sm:$0xff]  ;;  %v436_v22 = vld [vmem:[%s940_s4] ss:$0 sm:$0xff] }
  0x5b   :  { %612 = vmatprep.subr.bf16.mxu1 %v808_v1  ;;  %632 = vmatpush3.bf16.msra.mxu0 %v631_v36 }
  0x5c   :  { %633 = vmatprep.subr.bf16.mxu0 %v808_v1 }
  0x5e   :  { %614 = vmatpush3.bf16.msra.mxu1 %v613_v18  ;;  %v670_v18 = vpack.c.bf16 %v339_v17, %v338_v16 }
  0x5f   :  { %615 = vmatprep.subr.bf16.mxu1 %v808_v1  ;;  %635 = vmatpush3.bf16.msra.mxu0 %v634_v39 }
  0x60   :  { %636 = vmatprep.subr.bf16.mxu0 %v808_v1 }
  0x62   :  { %617 = vmatpush3.bf16.msra.mxu1 %v616_v21 }
  0x63   :  { %618 = vmatprep.subr.bf16.mxu1 %v808_v1  ;;  %638 = vmatpush3.bf16.msra.mxu0 %v637_v42 }
  0x64   :  { %639 = vmatprep.subr.bf16.mxu0 %v808_v1 }
  0x66   :  { %620 = vmatpush3.bf16.msra.mxu1 %v619_v24 }
  0x67   :  { %621 = vmatprep.subr.bf16.mxu1 %v808_v1  ;;  %641 = vmatpush3.bf16.msra.mxu0 %v640_v45 }
  0x68   :  { %642 = vmatprep.subr.bf16.mxu0 %v808_v1 }
  0x6a   :  { %623 = vmatpush3.bf16.msra.mxu1 %v622_v27 }
  0x6b   :  { %648 = vmatprep.subr.bf16.mxu1 %v808_v1  ;;  %644 = vmatpush3.bf16.msra.mxu0 %v643_v48 }
  0x6c   :  { %645 = vmatprep.subr.bf16.mxu0 %v808_v1 }
  0x6f   :  { %647 = vmatpush3.bf16.msra.mxu0 %v646_v54 }
 0x120   :  { %v144_v49 = vpop.f32.mrb[0].mxu0 }
 0x121   :  { %v148_v50 = vmax.f32 %v144_v49, 0.0  ;;  %v494_v51 = vpop.f32.mrb[1].mxu0 }
 0x123   :  { %528 = vmatmul.mubr.f32.vlgmr.msra.gmra.mrb[0].mxu1 %v148_v50 }
 0x124   :  { %597 = vmatprep.mubr.msk.f32.mxu1 %vm807_vm0, %v806_v0  ;;  %650 = vmatpush3.bf16.msra.mxu1 %v649_v58  ;;  %v330_v0 = vld [vmem:[#allocation8 + $0x30] sm:$0xff] }
 0x125   :  { %651 = vmatprep.subr.bf16.mxu1 %v808_v1  ;;  %v658_v3 = vpack.c.bf16 %v331_v2, %v330_v0 }
 0x128   :  { %653 = vmatpush3.bf16.msra.mxu1 %v652_v60 }
 0x129   :  { %654 = vmatprep.subr.bf16.mxu1 %v808_v1 }
 0x12c   :  { %656 = vmatpush3.bf16.msra.mxu1 %v655_v63 }
 0x12d   :  { %657 = vmatprep.subr.bf16.mxu1 %v808_v1 }
 0x130   :  { %659 = vmatpush3.bf16.msra.mxu1 %v658_v3 }
 0x131   :  { %660 = vmatprep.subr.bf16.mxu1 %v808_v1 }
 0x134   :  { %662 = vmatpush3.bf16.msra.mxu1 %v661_v6 }
 0x135   :  { %663 = vmatprep.subr.bf16.mxu1 %v808_v1 }
 0x138   :  { %665 = vmatpush3.bf16.msra.mxu1 %v664_v9 }
 0x139   :  { %666 = vmatprep.subr.bf16.mxu1 %v808_v1 }
 0x13c   :  { %668 = vmatpush3.bf16.msra.mxu1 %v667_v12 }
 0x13d   :  { %669 = vmatprep.subr.bf16.mxu1 %v808_v1 }
 0x140   :  { %671 = vmatpush3.bf16.msra.mxu1 %v670_v18 }
 0x1f6   :  { %v231_v13 = vpop.f32.mrb[0].mxu1 }
 0x1f7   :  { %v235_v14 = vmax.f32 %v231_v13, 0.0  ;;  %v529_v15 = vpop.f32.mrb[1].mxu1 }
 0x1f9   :  { %563 = vmatmul.mubr.f32.vlgmr.msra.gmra.mrb[2].mxu0 %v235_v14 }
 0x2cc   :  { %v319_v19 = vpop.f32.mrb[2].mxu0 }
 0x2cd   :  { %v323_v20 = vmax.f32 %v319_v19, 0.0  ;;  %v564_v21 = vpop.f32.mrb[3].mxu0 }
 0x2cf   :  { %598 = vmatmul.mubr.f32.vlgmr.msra.gmra.mrb[2].mxu1 %v323_v20 }
 0x3a2   :  { %v413_v23 = vpop.f32.mrb[2].mxu1 }
 0x3a3   :  { %v414_v1 = vadd.f32 %v436_v22, %v413_v23  ;;  %v599_v24 = vpop.f32.mrb[3].mxu1 }
 0x3a5   :  { %417 = vst [vmem:[#allocation10] sm:$0xff] %v414_v1 }
 0x3a6   :  { %781 = shalt.err (!%p778_p8)
}
 0x3a7   :  { %s782_s20 = scalar_lea.hbm %s941_s5, 128 }
 0x3a8   :  { %p783_p9 = scmp.ne.s32.totalorder %s941_s5, %s782_s20  ;;  %p786_p10 = scmp.lt.u32.totalorder %s782_s20, %s941_s5 }
 0x3aa   :  { %p788_p11 = pnand %p786_p10, %p783_p9 }
 0x3ac   :  { %791 = shalt.err (!%p788_p11)
}
 0x3ad   :  { %427 = dma.vmem_to_hbm [thread:$0]  %s425_s16, 128, %s941_s5, [#allocation4]  }
 0x3ae   :  { %798 = dma.done.wait [#allocation4], 128  }
 0x3af   :  { %799 = vsyncadd [#allocation4], 4294967168 }
 0x3b0   :  { %431 = vsyncpa [#allocation3], 1 }
 0x3b1   :  { %432 = vsyncpa [#allocation6], 1 }
 0x3b2   :  { %433 = vsyncpa [#allocation9], 1 }
 0x3b3   :  { %434 = vsyncpa [#allocation4], 1 }

</bundles_post_ra>
